<compile_context>
chip_gen: v5e
topology: v5e:2x2
jax: 0.10.0
libtpu: 0.0.40
codegen_flags: <defaults>
</compile_context>

<pallas_src>
import jax
import jax.numpy as jnp
from jax import lax
from jax.experimental import pallas as pl
from jax.experimental.pallas import tpu as pltpu

_TB = 8  # time block = one sublane group (8 rows) per recurrence iteration


def _round_up(x, m):
    return ((x + m - 1) // m) * m


def _bimini_gru_kernel(x_ref, w_ref, b_ref, h0_ref, h0r_ref, o_ref,
                       proj_s, carry_s):
    # x_ref: (Lt, C)   w_ref: (C, 4*Ht) bf16   b_ref: (1, 4*Ht) f32
    # h0_ref / h0r_ref: (1, Ht)   o_ref: (Lt, Ht)
    # proj_s: (Lt, 4*Ht) f32 scratch   carry_s: (1, Ht) f32 hidden-state carry
    lt = pl.program_id(2)
    Lt = x_ref.shape[0]
    Ht = h0_ref.shape[1]

    # ---- fused front-end: ONE bf16 MXU matmul (f32 accumulation) for all four
    # projections.  The three gate columns are passed through sigmoid here over
    # the whole (Lt, 3*Ht) tile: the EUP work becomes a long independent stream
    # hidden under the matmul instead of sitting on the serial h-chain.
    p = (jnp.dot(x_ref[...].astype(jnp.bfloat16), w_ref[...],
                 preferred_element_type=jnp.float32)
         + b_ref[...].astype(jnp.float32))
    proj_s[:, 0:Ht] = p[:, 0:Ht]                  # hbar (raw)
    proj_s[:, Ht:] = jax.nn.sigmoid(p[:, Ht:])    # sigmoid(z | s_fwd | s_rev)

    # ---- hidden-state carry across L-tiles ----------------------------------
    @pl.when(lt == 0)
    def _():
        carry_s[...] = h0_ref[...].astype(jnp.float32)

    h0r = jnp.broadcast_to(h0r_ref[...].astype(jnp.float32), (_TB, Ht))

    # Row masks for the Hillis-Steele sublane shifts, hoisted above the loop
    # (constants built once; the shifts use XLU rolls + VALU selects, so the
    # scan stays in registers -- no per-iteration concatenate constants).
    row = lax.broadcasted_iota(jnp.int32, (_TB, Ht), 0)
    shift_masks = tuple((off, row >= off) for off in (1, 2, 4))

    # ---- recurrence: 8 timesteps per iteration, all ops on full (8,Ht) tiles
    def body(blk, h_prev):                          # h_prev: (1, Ht) f32
        t0 = pl.multiple_of(blk * _TB, _TB)
        p = proj_s[pl.ds(t0, _TB), :]               # (8, 4*Ht), one unmasked load
        hbar = p[:, 0 * Ht:1 * Ht]
        z = p[:, 1 * Ht:2 * Ht]                     # already sigmoided
        s_fwd = p[:, 2 * Ht:3 * Ht]
        s_rev = p[:, 3 * Ht:4 * Ht]

        # h[t] = a[t]*h[t-1] + c[t],  a = 1 - z,  c = z*hbar.
        # Hillis-Steele scan over the 8 sublanes: log2(8)=3 shifted affine
        # compositions; information flows only toward higher row indices.
        a = 1.0 - z
        c = z * hbar
        for off, m in shift_masks:
            a_sh = jnp.where(m, pltpu.roll(a, off, 0), 1.0)
            c_sh = jnp.where(m, pltpu.roll(c, off, 0), 0.0)
            c = a * c_sh + c
            a = a * a_sh
        h_blk = a * h_prev + c                      # (8, Ht)

        # Fused output write: a single unmasked (8, Ht) store.
        o_ref[pl.ds(t0, _TB), :] = (
            h_blk * s_fwd + h0r * s_rev).astype(o_ref.dtype)
        return h_blk[_TB - 1:_TB, :]

    nblk = Lt // _TB
    carry_s[...] = lax.fori_loop(0, nblk, body, carry_s[...],
                                 unroll=min(4, nblk))


def _pack_params(params, Ht):
    """Fuse the four (C,H) projections into one (C, nH*4*Ht) bf16 matrix so the
    columns of H-tile j are [hbar_j | z_j | s_fwd_j | s_rev_j]."""
    wh, wz, ws, wsr = params["wh"], params["wz"], params["ws"], params["wsr"]
    bh, bz, bs, bsr = params["bh"], params["bz"], params["bs"], params["bsr"]
    C, H = wh.shape
    nH = H // Ht
    w = jnp.stack([wh, wz, ws, wsr], axis=1)                 # (C, 4, H)
    w = w.reshape(C, 4, nH, Ht).transpose(0, 2, 1, 3).reshape(C, nH * 4 * Ht)
    b = jnp.stack([bh, bz, bs, bsr], axis=1)                 # (1, 4, H)
    b = b.reshape(1, 4, nH, Ht).transpose(0, 2, 1, 3).reshape(1, nH * 4 * Ht)
    return w.astype(jnp.bfloat16), b.astype(jnp.float32)


def bimini_gru(x, params, *, l_tile=512, h_tile=None):
    B, L, C = x.shape
    H = params["wh"].shape[1]

    # H-tile: 128 lanes by default (keeps an extra "parallel" grid axis so both
    # v7x TensorCores get work even when B is small).  On v6e (single TC, wide
    # MXU, 128 MiB VMEM) pass h_tile=256 for large H to halve x re-reads.
    if h_tile is None:
        Ht = 128 if (H > 128 and H % 128 == 0) else H
    else:
        Ht = h_tile
    assert H % Ht == 0, (H, Ht)
    nH = H // Ht

    # L-tile: large by default (512 rows) to amortize per-grid-step pipeline
    # overhead; multiple of 8 sublanes; capped by the sequence length.
    Lt = _round_up(min(l_tile, _round_up(L, _TB)), _TB)
    # Ragged tail is handled by Pallas edge-block masking: no host-side
    # jnp.pad(x) and no out[:, :L] copy.  Garbage tail rows only feed tail
    # outputs (dropped on writeback) and a carry that is reset at lt == 0.
    nL = pl.cdiv(L, Lt)

    w_pack, b_pack = _pack_params(params, Ht)

    # Rough per-step VMEM budget (double-buffered streams + scratch); raise the
    # scoped limit only when the platform default (16 MiB v5e / 32 MiB v6e,v7x)
    # could be too small, capped at v7x's 64 MiB physical ceiling.
    est = (2 * Lt * C * x.dtype.itemsize          # x tile (double buffered)
           + 2 * C * 4 * Ht * 2                   # bf16 packed weights
           + 2 * Lt * Ht * x.dtype.itemsize       # output tile
           + Lt * 4 * Ht * 4                      # proj scratch (f32)
           + 16 * Ht * 4)                         # bias / h0 / carry
    vmem_limit = int(min(64 * 2**20, 2 * est)) if est > 12 * 2**20 else None

    grid_spec = pltpu.PrefetchScalarGridSpec(
        num_scalar_prefetch=0,
        # H-tile outermost: the packed-weight block index changes only nH times
        # (not B*nH), so weights are streamed from HBM once per H-tile.
        grid=(nH, B, nL),
        in_specs=[
            pl.BlockSpec((pl.Squeezed(), Lt, C), lambda j, b, lt: (b, lt, 0)),
            pl.BlockSpec((C, 4 * Ht), lambda j, b, lt: (0, j)),
            pl.BlockSpec((1, 4 * Ht), lambda j, b, lt: (0, j)),
            pl.BlockSpec((1, Ht), lambda j, b, lt: (0, j)),
            pl.BlockSpec((1, Ht), lambda j, b, lt: (0, j)),
        ],
        out_specs=pl.BlockSpec((pl.Squeezed(), Lt, Ht),
                               lambda j, b, lt: (b, lt, j)),
        scratch_shapes=[
            pltpu.VMEM((Lt, 4 * Ht), jnp.float32),   # fused projections
            pltpu.VMEM((1, Ht), jnp.float32),        # hidden-state carry
        ],
    )

    return pl.pallas_call(
        _bimini_gru_kernel,
        out_shape=jax.ShapeDtypeStruct((B, L, H), x.dtype),
        grid_spec=grid_spec,
        compiler_params=pltpu.CompilerParams(
            dimension_semantics=("parallel", "parallel", "arbitrary"),
            vmem_limit_bytes=vmem_limit),
    )(x, w_pack, b_pack, params["h0"], params["h0r"])


def init_params(key, in_channels, hidden_size):
    """Deterministic init mimicking nn.Linear (uniform +-1/sqrt(C)); h0 = zeros."""
    keys = jax.random.split(key, 8)
    bound = 1.0 / (in_channels ** 0.5)

    def lin(kw, kb):
        w = jax.random.uniform(kw, (in_channels, hidden_size), jnp.float32,
                               -bound, bound)
        b = jax.random.uniform(kb, (1, hidden_size), jnp.float32, -bound, bound)
        return w, b

    wh, bh = lin(keys[0], keys[1])
    wz, bz = lin(keys[2], keys[3])
    ws, bs = lin(keys[4], keys[5])
    wsr, bsr = lin(keys[6], keys[7])
    return dict(wh=wh, bh=bh, wz=wz, bz=bz, ws=ws, bs=bs,
                h0=jnp.zeros((1, hidden_size), jnp.float32),
                wsr=wsr, bsr=bsr,
                h0r=jnp.zeros((1, hidden_size), jnp.float32))


def ref_forward(x, p):
    """Pure-JAX f32 reference matching the PyTorch forward semantics."""
    hbar = x @ p["wh"] + p["bh"]
    z = jax.nn.sigmoid(x @ p["wz"] + p["bz"])
    s = jax.nn.sigmoid(x @ p["ws"] + p["bs"])
    s_rev = jax.nn.sigmoid(x @ p["wsr"] + p["bsr"])

    def step(h_prev, inp):
        z_t, hb_t = inp
        h_t = z_t * hb_t + (1.0 - z_t) * h_prev
        return h_t, h_t

    B = x.shape[0]
    h0 = jnp.broadcast_to(p["h0"], (B, p["h0"].shape[1]))
    _, hs = lax.scan(step, h0, (jnp.swapaxes(z, 0, 1), jnp.swapaxes(hbar, 0, 1)))
    hs = jnp.swapaxes(hs, 0, 1)
    return hs * s + p["h0r"][None] * s_rev


if __name__ == "__main__":
    key = jax.random.PRNGKey(0)

    # Kernel does its projections in bf16 (MXU) with f32 accumulation, so the
    # comparison against the pure-f32 reference uses a bf16-level tolerance.
    TOL = 2e-2

    # Case 1: module-sized small shapes (single L-tile, single H-tile).
    B, L, C, H = 2, 8, 4, 32
    k1, k2, k3, k4 = jax.random.split(key, 4)
    x = jax.random.normal(k1, (B, L, C), dtype=jnp.float32)
    params = init_params(k2, C, H)
    out = jax.block_until_ready(bimini_gru(x, params))
    ref = ref_forward(x, params)
    assert out.shape == (B, L, H), out.shape
    assert jnp.allclose(out, ref, atol=TOL, rtol=TOL), \
        float(jnp.max(jnp.abs(out - ref)))

    # Case 2: exercises L-tiling + a ragged tail block (L=40, Lt=16 -> 3 blocks,
    # last one half-valid) and H-tiling (H=256 -> 2 H-tiles).
    B2, L2, C2, H2 = 2, 40, 4, 256
    x2 = jax.random.normal(k3, (B2, L2, C2), dtype=jnp.float32)
    params2 = init_params(k4, C2, H2)
    out2 = jax.block_until_ready(bimini_gru(x2, params2, l_tile=16))
    ref2 = ref_forward(x2, params2)
    assert out2.shape == (B2, L2, H2), out2.shape
    assert jnp.allclose(out2, ref2, atol=TOL, rtol=TOL), \
        float(jnp.max(jnp.abs(out2 - ref2)))

    print("KERNEL_OK")
</pallas_src>

<mosaic_0001>
module attributes {stable_mosaic.version = 11 : i64} {
  func.func @_bimini_gru_kernel(%arg0: i32, %arg1: i32, %arg2: i32, %arg3: memref<1x8x4xf32, #tpu.memory_space<vmem>>, %arg4: memref<4x128xbf16, #tpu.memory_space<vmem>>, %arg5: memref<1x128xf32, #tpu.memory_space<vmem>>, %arg6: memref<1x32xf32, #tpu.memory_space<vmem>>, %arg7: memref<1x32xf32, #tpu.memory_space<vmem>>, %arg8: memref<1x8x32xf32, #tpu.memory_space<vmem>>, %arg9: memref<8x128xf32, #tpu.memory_space<vmem>>, %arg10: memref<1x32xf32, #tpu.memory_space<vmem>>) attributes {dimension_semantics = [#tpu.dimension_semantics<parallel>, #tpu.dimension_semantics<parallel>, #tpu.dimension_semantics<arbitrary>], iteration_bounds = array<i64: 1, 2, 1>, scalar_prefetch = 0 : i64, scratch_operands = 2 : i64, tpu.core_type = #tpu.core_type<tc>, window_params = [{transform_indices = @transform_0, window_bounds = array<i64: 1, 8, 4>}, {transform_indices = @transform_1, window_bounds = array<i64: 4, 128>}, {transform_indices = @transform_2, window_bounds = array<i64: 1, 128>}, {transform_indices = @transform_3, window_bounds = array<i64: 1, 32>}, {transform_indices = @transform_4, window_bounds = array<i64: 1, 32>}, {transform_indices = @transform_5, window_bounds = array<i64: 1, 8, 32>}]} {
    %c0 = arith.constant 0 : index
    %c0_0 = arith.constant 0 : index
    %c0_1 = arith.constant 0 : index
    %0 = vector.load %arg3[%c0, %c0_0, %c0_1] : memref<1x8x4xf32, #tpu.memory_space<vmem>>, vector<1x8x4xf32>
    %1 = vector.shape_cast %0 : vector<1x8x4xf32> to vector<8x4xf32>
    %2 = arith.truncf %1 : vector<8x4xf32> to vector<8x4xbf16>
    %c0_2 = arith.constant 0 : index
    %c0_3 = arith.constant 0 : index
    %3 = vector.load %arg4[%c0_2, %c0_3] : memref<4x128xbf16, #tpu.memory_space<vmem>>, vector<4x128xbf16>
    %cst = arith.constant dense<0.000000e+00> : vector<8x128xf32>
    %4 = tpu.matmul %2, %3, %cst {dimension_numbers = #tpu.dot_dimension_numbers<[1], [0], [0], [1], [0, 0, 1, 1], [], []>} : vector<8x4xbf16>, vector<4x128xbf16>, vector<8x128xf32> -> vector<8x128xf32>
    %c0_4 = arith.constant 0 : index
    %c0_5 = arith.constant 0 : index
    %5 = vector.load %arg5[%c0_4, %c0_5] : memref<1x128xf32, #tpu.memory_space<vmem>>, vector<1x128xf32>
    %6 = vector.broadcast %5 : vector<1x128xf32> to vector<8x128xf32>
    %7 = arith.addf %4, %6 : vector<8x128xf32>
    %8 = vector.extract_strided_slice %7 {offsets = [0, 0], sizes = [8, 32], strides = [1, 1]} : vector<8x128xf32> to vector<8x32xf32>
    %c0_6 = arith.constant 0 : index
    %c0_7 = arith.constant 0 : index
    %9 = vector.load %arg9[%c0_6, %c0_7] : memref<8x128xf32, #tpu.memory_space<vmem>>, vector<8x32xf32>
    tpu.vector_store %arg9[%c0_6, %c0_7], %8 {strides = array<i32>} : memref<8x128xf32, #tpu.memory_space<vmem>>, vector<8x32xf32>,
    %10 = vector.extract_strided_slice %7 {offsets = [0, 32], sizes = [8, 96], strides = [1, 1]} : vector<8x128xf32> to vector<8x96xf32>
    %11 = arith.negf %10 : vector<8x96xf32>
    %12 = math.exp %11 : vector<8x96xf32>
    %cst_8 = arith.constant 1.000000e+00 : f32
    %13 = vector.broadcast %cst_8 : f32 to vector<8x96xf32>
    %14 = arith.addf %13, %12 : vector<8x96xf32>
    %15 = arith.divf %13, %14 : vector<8x96xf32>
    %c0_9 = arith.constant 0 : index
    %c32 = arith.constant 32 : index
    %16 = vector.load %arg9[%c0_9, %c32] : memref<8x128xf32, #tpu.memory_space<vmem>>, vector<8x96xf32>
    tpu.vector_store %arg9[%c0_9, %c32], %15 {strides = array<i32>} : memref<8x128xf32, #tpu.memory_space<vmem>>, vector<8x96xf32>,
    %c0_i32 = arith.constant 0 : i32
    %17 = arith.cmpi eq, %arg2, %c0_i32 : i32
    %18 = arith.extui %17 : i1 to i32
    %c0_i32_10 = arith.constant 0 : i32
    %19 = arith.cmpi ne, %18, %c0_i32_10 : i32
    scf.if %19 {
      %c0_35 = arith.constant 0 : index
      %c0_36 = arith.constant 0 : index
      %81 = vector.load %arg6[%c0_35, %c0_36] : memref<1x32xf32, #tpu.memory_space<vmem>>, vector<1x32xf32>
      %c0_37 = arith.constant 0 : index
      %c0_38 = arith.constant 0 : index
      %82 = vector.load %arg10[%c0_37, %c0_38] : memref<1x32xf32, #tpu.memory_space<vmem>>, vector<1x32xf32>
      tpu.vector_store %arg10[%c0_37, %c0_38], %81 {strides = array<i32>} : memref<1x32xf32, #tpu.memory_space<vmem>>, vector<1x32xf32>,
    } else {
    }
    %c0_11 = arith.constant 0 : index
    %c0_12 = arith.constant 0 : index
    %20 = vector.load %arg7[%c0_11, %c0_12] : memref<1x32xf32, #tpu.memory_space<vmem>>, vector<1x32xf32>
    %21 = vector.shape_cast %20 : vector<1x32xf32> to vector<1x32xf32>
    %22 = vector.broadcast %21 : vector<1x32xf32> to vector<8x32xf32>
    %23 = tpu.iota {dimensions = array<i32: 0>} : vector<8x32xi32>
    %c1_i32 = arith.constant 1 : i32
    %24 = vector.broadcast %c1_i32 : i32 to vector<8x32xi32>
    %25 = arith.cmpi sge, %23, %24 : vector<8x32xi32>
    %c2_i32 = arith.constant 2 : i32
    %26 = vector.broadcast %c2_i32 : i32 to vector<8x32xi32>
    %27 = arith.cmpi sge, %23, %26 : vector<8x32xi32>
    %c4_i32 = arith.constant 4 : i32
    %28 = vector.broadcast %c4_i32 : i32 to vector<8x32xi32>
    %29 = arith.cmpi sge, %23, %28 : vector<8x32xi32>
    %c0_13 = arith.constant 0 : index
    %c0_14 = arith.constant 0 : index
    %30 = vector.load %arg10[%c0_13, %c0_14] : memref<1x32xf32, #tpu.memory_space<vmem>>, vector<1x32xf32>
    %c0_i32_15 = arith.constant 0 : i32
    %c8_i32 = arith.constant 8 : i32
    %31 = arith.muli %c0_i32_15, %c8_i32 : i32
    %32 = tpu.assume_multiple %31, 8 : i32
    %33 = arith.index_cast %32 : i32 to index
    %c0_16 = arith.constant 0 : index
    %34 = vector.load %arg9[%33, %c0_16] : memref<8x128xf32, #tpu.memory_space<vmem>>, vector<8x128xf32>
    %35 = vector.extract_strided_slice %34 {offsets = [0, 0], sizes = [8, 32], strides = [1, 1]} : vector<8x128xf32> to vector<8x32xf32>
    %36 = vector.extract_strided_slice %34 {offsets = [0, 32], sizes = [8, 32], strides = [1, 1]} : vector<8x128xf32> to vector<8x32xf32>
    %37 = vector.extract_strided_slice %34 {offsets = [0, 64], sizes = [8, 32], strides = [1, 1]} : vector<8x128xf32> to vector<8x32xf32>
    %38 = vector.extract_strided_slice %34 {offsets = [0, 96], sizes = [8, 32], strides = [1, 1]} : vector<8x128xf32> to vector<8x32xf32>
    %cst_17 = arith.constant 1.000000e+00 : f32
    %39 = vector.broadcast %cst_17 : f32 to vector<8x32xf32>
    %40 = arith.subf %39, %36 : vector<8x32xf32>
    %41 = arith.mulf %36, %35 : vector<8x32xf32>
    %c1_i32_18 = arith.constant 1 : i32
    %42 = tpu.dynamic_rotate %40 by %c1_i32_18 dim 0 : vector<8x32xf32>, i32 -> vector<8x32xf32>
    %cst_19 = arith.constant 1.000000e+00 : f32
    %43 = vector.broadcast %cst_19 : f32 to vector<8x32xf32>
    %44 = arith.select %25, %42, %43 : vector<8x32xi1>, vector<8x32xf32>
    %c1_i32_20 = arith.constant 1 : i32
    %45 = tpu.dynamic_rotate %41 by %c1_i32_20 dim 0 : vector<8x32xf32>, i32 -> vector<8x32xf32>
    %cst_21 = arith.constant 0.000000e+00 : f32
    %46 = vector.broadcast %cst_21 : f32 to vector<8x32xf32>
    %47 = arith.select %25, %45, %46 : vector<8x32xi1>, vector<8x32xf32>
    %48 = arith.mulf %40, %47 : vector<8x32xf32>
    %49 = arith.addf %48, %41 : vector<8x32xf32>
    %50 = arith.mulf %40, %44 : vector<8x32xf32>
    %c2_i32_22 = arith.constant 2 : i32
    %51 = tpu.dynamic_rotate %50 by %c2_i32_22 dim 0 : vector<8x32xf32>, i32 -> vector<8x32xf32>
    %cst_23 = arith.constant 1.000000e+00 : f32
    %52 = vector.broadcast %cst_23 : f32 to vector<8x32xf32>
    %53 = arith.select %27, %51, %52 : vector<8x32xi1>, vector<8x32xf32>
    %c2_i32_24 = arith.constant 2 : i32
    %54 = tpu.dynamic_rotate %49 by %c2_i32_24 dim 0 : vector<8x32xf32>, i32 -> vector<8x32xf32>
    %cst_25 = arith.constant 0.000000e+00 : f32
    %55 = vector.broadcast %cst_25 : f32 to vector<8x32xf32>
    %56 = arith.select %27, %54, %55 : vector<8x32xi1>, vector<8x32xf32>
    %57 = arith.mulf %50, %56 : vector<8x32xf32>
    %58 = arith.addf %57, %49 : vector<8x32xf32>
    %59 = arith.mulf %50, %53 : vector<8x32xf32>
    %c4_i32_26 = arith.constant 4 : i32
    %60 = tpu.dynamic_rotate %59 by %c4_i32_26 dim 0 : vector<8x32xf32>, i32 -> vector<8x32xf32>
    %cst_27 = arith.constant 1.000000e+00 : f32
    %61 = vector.broadcast %cst_27 : f32 to vector<8x32xf32>
    %62 = arith.select %29, %60, %61 : vector<8x32xi1>, vector<8x32xf32>
    %c4_i32_28 = arith.constant 4 : i32
    %63 = tpu.dynamic_rotate %58 by %c4_i32_28 dim 0 : vector<8x32xf32>, i32 -> vector<8x32xf32>
    %cst_29 = arith.constant 0.000000e+00 : f32
    %64 = vector.broadcast %cst_29 : f32 to vector<8x32xf32>
    %65 = arith.select %29, %63, %64 : vector<8x32xi1>, vector<8x32xf32>
    %66 = arith.mulf %59, %65 : vector<8x32xf32>
    %67 = arith.addf %66, %58 : vector<8x32xf32>
    %68 = arith.mulf %59, %62 : vector<8x32xf32>
    %69 = vector.broadcast %30 : vector<1x32xf32> to vector<8x32xf32>
    %70 = arith.mulf %68, %69 : vector<8x32xf32>
    %71 = arith.addf %70, %67 : vector<8x32xf32>
    %72 = arith.mulf %71, %37 : vector<8x32xf32>
    %73 = arith.mulf %22, %38 : vector<8x32xf32>
    %74 = arith.addf %72, %73 : vector<8x32xf32>
    %c0_30 = arith.constant 0 : index
    %75 = arith.index_cast %32 : i32 to index
    %c0_31 = arith.constant 0 : index
    %76 = vector.load %arg8[%c0_30, %75, %c0_31] : memref<1x8x32xf32, #tpu.memory_space<vmem>>, vector<1x8x32xf32>
    %77 = vector.shape_cast %76 : vector<1x8x32xf32> to vector<8x32xf32>
    %78 = vector.shape_cast %74 : vector<8x32xf32> to vector<1x8x32xf32>
    tpu.vector_store %arg8[%c0_30, %75, %c0_31], %78 {strides = array<i32>} : memref<1x8x32xf32, #tpu.memory_space<vmem>>, vector<1x8x32xf32>,
    %79 = vector.extract_strided_slice %71 {offsets = [7, 0], sizes = [1, 32], strides = [1, 1]} : vector<8x32xf32> to vector<1x32xf32>
    %c1_i32_32 = arith.constant 1 : i32
    %c0_33 = arith.constant 0 : index
    %c0_34 = arith.constant 0 : index
    %80 = vector.load %arg10[%c0_33, %c0_34] : memref<1x32xf32, #tpu.memory_space<vmem>>, vector<1x32xf32>
    tpu.vector_store %arg10[%c0_33, %c0_34], %79 {strides = array<i32>} : memref<1x32xf32, #tpu.memory_space<vmem>>, vector<1x32xf32>,
    return
  }
  func.func @transform_0(%arg0: i32, %arg1: i32, %arg2: i32) -> (i32, i32, i32) {
    %c0_i32 = arith.constant 0 : i32
    %c0_i32_0 = arith.constant 0 : i32
    return %arg1, %arg2, %c0_i32 : i32, i32, i32
  }
  func.func @transform_1(%arg0: i32, %arg1: i32, %arg2: i32) -> (i32, i32) {
    %c0_i32 = arith.constant 0 : i32
    %c0_i32_0 = arith.constant 0 : i32
    return %c0_i32, %arg0 : i32, i32
  }
  func.func @transform_2(%arg0: i32, %arg1: i32, %arg2: i32) -> (i32, i32) {
    %c0_i32 = arith.constant 0 : i32
    %c0_i32_0 = arith.constant 0 : i32
    return %c0_i32, %arg0 : i32, i32
  }
  func.func @transform_3(%arg0: i32, %arg1: i32, %arg2: i32) -> (i32, i32) {
    %c0_i32 = arith.constant 0 : i32
    %c0_i32_0 = arith.constant 0 : i32
    return %c0_i32, %arg0 : i32, i32
  }
  func.func @transform_4(%arg0: i32, %arg1: i32, %arg2: i32) -> (i32, i32) {
    %c0_i32 = arith.constant 0 : i32
    %c0_i32_0 = arith.constant 0 : i32
    return %c0_i32, %arg0 : i32, i32
  }
  func.func @transform_5(%arg0: i32, %arg1: i32, %arg2: i32) -> (i32, i32, i32) {
    %c0_i32 = arith.constant 0 : i32
    return %arg1, %arg2, %arg0 : i32, i32, i32
  }
}

</mosaic_0001>

<bundles_post_ra>
// kernel: tpu_custom_call.1
= control target key start
LH: loop header
LB: loop body
LE: loop exit
PB: predicated region body
PF: predicated region fallthrough
CT: control target
= control target key end

     0   :  { %10 = vsyncpa [#allocation5], 0  ;;  %s952_s0 = inlined_call_operand.vmem [shape: f32[2,8,4], index: 0, kind: input, shape index: {}]   ;;  %s953_s1 = inlined_call_operand.vmem [shape: bf16[4,128], index: 1, kind: input, shape index: {}]   ;;  %s954_s2 = inlined_call_operand.vmem [shape: f32[1,128], index: 2, kind: input, shape index: {}]   ;;  %s955_s3 = inlined_call_operand.vmem [shape: f32[1,32], index: 3, kind: input, shape index: {}]   ;;  %s956_s4 = inlined_call_operand.vmem [shape: f32[1,32], index: 4, kind: input, shape index: {}]   ;;  %s957_s5 = inlined_call_operand.hbm [shape: f32[2,8,32], index: 5, kind: output, shape index: {}]  }
   0x1   :  { %12 = vsyncpa [#allocation5 + $0x1], 0  ;;  %s823_s18 = smov 0   ;;  %s825_s19 = smov 0  }
   0x2   :  { %s827_s20 = smov 0   ;;  %s829_s21 = smov 0  }
   0x3   :  { %s831_s22 = smov 0   ;;  %s833_s23 = smov 0  }
   0x4 LB: > { %s630_s24 = sadd.s32 4294967295, %s789_s23   ;;  %s631_s25 = sadd.s32 4294967294, %s789_s23   ;;  %s789_s23 = sphi %s833_s23, %s18_s23   ;;  %s785_s22 = sphi %s831_s22, %s964_s22   ;;  %s781_s21 = sphi %s829_s21, %s963_s21   ;;  %s777_s20 = sphi %s827_s20, %s962_s20   ;;  %s773_s19 = sphi %s825_s19, %s961_s19   ;;  %s769_s18 = sphi %s823_s18, %s960_s18  }
   0x5   : > { %s33_s26 = sadd.s32 1, %s785_s22  ;;  %s180_s27 = sadd.s32 1, %s777_s20 }
   0x6   : > { %p35_p0 = scmp.ge.s32.totalorder %s33_s26, 2  ;;  %p190_p1 = scmp.ne.s32.totalorder %s777_s20, %s773_s19 }
   0x7   : > { %p191_p2 = scmp.eq.s32.totalorder %s630_s24, 1  ;;  %p196_p3 = scmp.ne.s32.totalorder %s773_s19, %s769_s18 }
   0x8   : > { %s966_s26 = smov (%p35_p0, %s33_s26), 0  ;;  %p197_p5 = scmp.eq.s32.totalorder %s631_s25, 1 }
   0x9   : > { %p863_p4 = por %p191_p2, %p190_p1  ;;  %s173_s29 = ssub.s32 %s785_s22, %s966_s26 }
   0xa   : > { %p638_p6 = scmp.ge.s32.totalorder %s789_s23, 1  ;;  %p178_p7 = scmp.eq.s32.totalorder %s173_s29, 0 }
   0xb   : > { %p870_p8 = por %p197_p5, %p196_p3  ;;  %p250_p9 = scmp.lt.s32.totalorder %s789_s23, 3 }
   0xc   : > { %s876_s6 = scalar_select %p178_p7, %s777_s20, %s180_s27  }
   0xd   : > { %p251_p10 = pnand %p638_p6, %p250_p9 }
   0xe   : > { %p293_p11 = scmp.lt.s32.totalorder (!%p251_p10), %s781_s21, 1  ;;  %s791_s16 = smov (!%p251_p10), 32  }
   0xf   : > { %254 = sbr.rel (%p251_p10) target bundleno = 1097 (0x449), region = 40  ;;  %s792_s17 = smov (!%p251_p10), 96  }
  0x10   : > { %s290_s7 = sand.u32 (!%p251_p10), 1, %s773_s19   ;;  %s731_s27 = scalar_lea.hbm (!%p251_p10), %s957_s5, 16 }
  0x11   : > { %s639_s8 = sshll.u32 (!%p251_p10), %s290_s7, 3 }
  0x14   : > { %v316_v0 = vld [vmem:[%s953_s1] sm:$0x3]  ;;  %vm325_vm0 = vcmask 1041408   ;;  %s294_s9 = scalar_select %p293_p11, %s781_s21, 1  ;;  %vm321_vm1 = vcmask 31744   ;;  %vm342_vm2 = vcmask 261120   ;;  %v376_v23 = vlaneseq }
  0x15   : > { %v327_v1 = vsel %vm325_vm0, %v316_v0, 0  ;;  %v704_v4 = vld [vmem:[%s954_s2] ss:$0 sm:$0xff]  ;;  %vm363_vm6 = vcmask 1047808   ;;  %vm370_vm10 = vcmask 253952   ;;  %vm484_vm12 = vcmask 261127  }
  0x16   : > { %336 = vmatpush.bf16.msra.mxu0 %v327_v1  ;;  %s640_s10 = sshll.u32 %s294_s9, 3  ;;  %v377_v24 = vshrl.u32 %v376_v23, 7  ;;  %v369_v46 = vld [vmem:[%s955_s3] sm:$0x1]  ;;  %s644_s9 = sshll.u32 %s781_s21, 3 }
  0x17   : > { %s299_s13 = scalar_lea.vmem %s952_s0, %s640_s10  ;;  %371 = vst.msk [vmem:[#allocation3] sm:$0x1] %vm370_vm10, %v369_v46  ;;  %v705_v54 = vld [vmem:[%s956_s4] ss:$0 sm:$0xff]  ;;  %s499_s12 = scalar_lea.hbm %s957_s5, %s644_s9 }
  0x18   : > { %v314_v2 = vld [vmem:[%s299_s13] sm:$0xff]  ;;  %vm378_vm8 = vcmp.ge.s32.totalorder %v377_v24, 1  ;;  %vm379_vm9 = vcmp.ge.s32.totalorder %v377_v24, 2  ;;  %vm380_vm11 = vcmp.ge.s32.totalorder %v377_v24, 4  ;;  %s292_s13 = scalar_lea.vmem [#allocation4], %s639_s8  ;;  %s503_s15 = sshll.u32 %s499_s12, 4  ;;  %s504_s15 = int_to_ptr.hbm [resolvable:$true] %s503_s15 }
  0x19   : > { %v315_v3 = vpack.c.bf16 %v314_v2, %v314_v2  ;;  %s501_s14 = sshll.u32 %s292_s13, 4  ;;  %s502_s14 = int_to_ptr.vmem [resolvable:$true] %s501_s14 }
  0x1b   : > { %641 = vmatmul.msk.bf16.vlgmr.msra.gmra.mxu0 %vm321_vm1, %v315_v3 }
  0x1e   : > { %v706_v52 = vld [vmem:[#allocation3] ss:$0 sm:$0xff] }
  0x98   : > { %v338_v5 = vpop.f32.mrf.mxu0 }
  0x99   : > { %v339_v6 = vadd.f32 %v704_v4, %v338_v5 }
  0x9b   : > { %343 = vst.msk [vmem:[#allocation2] sm:$0xff] %vm342_vm2, %v339_v6  ;;  %v642_v7 = vmul.f32 -1.442695, %v339_v6 }
  0x9d   : > { %707 = vpow2.f32 %v642_v7 }
  0xa0   : > { %v340_v8 = vpop.f32.mrf.mxu0 }
  0xa3   : > { %v708_v9 = vpop.eup %707 }
  0xa4   : > { %v347_v10 = vadd.f32 1.0, %v708_v9 }
  0xa6   : > { %709 = vrcp.f32 %v347_v10  ;;  %v359_v14 = vand.u32 2147483648, %v347_v10  ;;  %v357_v16 = vand.u32 2147483647, %v347_v10  ;;  %vm353_vm4 = vweird.f32 %v347_v10 }
  0xa8   : > { %v360_v18 = vor.u32 1.1754944e-38, %v359_v14  ;;  %vm358_vm7 = vcmp.eq.f32.partialorder %v357_v16, 8.507059e+37 }
  0xac   : > { %v710_v11 = vpop.eup %709 }
  0xad   : > { %v349_v12 = vmul.f32 %v710_v11, %v347_v10  ;;  %vm354_vm3 = vweird.f32 %v710_v11 }
  0xae   : > { %vm355_vm5 = vmor %vm353_vm4, %vm354_vm3 }
  0xaf   : > { %v350_v13 = vsub.f32 1.0, %v349_v12 }
  0xb1   : > { %v351_v15 = vmul.f32 %v710_v11, %v350_v13 }
  0xb3   : > { %v352_v17 = vadd.f32 %v710_v11, %v351_v15 }
  0xb5   : > { %v356_v19 = vsel %vm355_vm5, %v710_v11, %v352_v17 }
  0xb6   : > { %v361_v20 = vsel %vm358_vm7, %v360_v18, %v356_v19 }
  0xb7   : > { %364 = vst.msk [vmem:[#allocation2] sm:$0xff] %vm363_vm6, %v361_v20 }
  0xbe   : > { %v382_v21 = vld [vmem:[#allocation2] sm:$0xff] }
  0xbf   : > { %385 = vrot.lane.b32.xlu0 %v382_v21, %s791_s16  ;;  %v383_v22 = vsub.f32 1.0, %v382_v21 }
  0xc1   : > { %390 = vrot.lane.b32.xlu1 %v383_v22, %s792_s17 }
 0x131   : > { %v386_v25 = vpop.permute.xlu0 %385 }
 0x132   : > { %v388_v26 = vmul.f32 %v386_v25, %v382_v21  ;;  %v469_v55 = vmul.f32 %v705_v54, %v386_v25 }
 0x133   : > { %v391_v27 = vpop.permute.xlu1 %390 }
 0x134   : > { %v393_v28 = vrot.slane %v391_v27, 7  ;;  %396 = vrot.lane.b32.xlu0 %v388_v26, %s792_s17 }
 0x136   : > { %v394_v29 = vsel %vm378_vm8, %v393_v28, 1.0 }
 0x137   : > { %408 = vrot.lane.b32.xlu2 %v394_v29, %s791_s16 }
 0x191   : > { %v409_v30 = vpop.permute.xlu2 %408 }
 0x192   : > { %v411_v31 = vmul.f32 %v409_v30, %v383_v22 }
 0x194   : > { %413 = vrot.lane.b32.xlu0 %v411_v31, %s792_s17 }
 0x1a6   : > { %v397_v32 = vpop.permute.xlu0 %396 }
 0x1a7   : > { %v399_v33 = vrot.slane %v397_v32, 7 }
 0x1a9   : > { %v400_v34 = vsel %vm378_vm8, %v399_v33, 0.0 }
 0x1aa   : > { %402 = vrot.lane.b32.xlu1 %v400_v34, %s791_s16 }
 0x206   : > { %v414_v38 = vpop.permute.xlu0 %413 }
 0x207   : > { %v416_v39 = vrot.slane %v414_v38, 6 }
 0x209   : > { %v417_v40 = vsel %vm379_vm9, %v416_v39, 1.0 }
 0x21c   : > { %v403_v35 = vpop.permute.xlu1 %402 }
 0x21d   : > { %v405_v36 = vmul.f32 %v403_v35, %v383_v22 }
 0x21f   : > { %v406_v37 = vadd.f32 %v405_v36, %v388_v26 }
 0x221   : > { %419 = vrot.lane.b32.xlu2 %v406_v37, %s792_s17 }
 0x229   : > { %431 = vrot.lane.b32.xlu2 %v417_v40, %s791_s16 }
 0x27b   : > { %v420_v41 = vpop.permute.xlu2 %419 }
 0x27c   : > { %v422_v42 = vrot.slane %v420_v41, 6 }
 0x27e   : > { %v423_v43 = vsel %vm379_vm9, %v422_v42, 0.0 }
 0x27f   : > { %425 = vrot.lane.b32.xlu1 %v423_v43, %s791_s16 }
 0x283   : > { %v432_v44 = vpop.permute.xlu2 %431 }
 0x284   : > { %v434_v45 = vmul.f32 %v432_v44, %v411_v31 }
 0x286   : > { %436 = vrot.lane.b32.xlu0 %v434_v45, %s792_s17 }
 0x2f1   : > { %v426_v47 = vpop.permute.xlu1 %425 }
 0x2f2   : > { %v428_v48 = vmul.f32 %v426_v47, %v411_v31 }
 0x2f4   : > { %v429_v49 = vadd.f32 %v428_v48, %v406_v37 }
 0x2f6   : > { %442 = vrot.lane.b32.xlu1 %v429_v49, %s792_s17 }
 0x2f8   : > { %v437_v50 = vpop.permute.xlu0 %436 }
 0x2f9   : > { %v439_v51 = vrot.slane %v437_v50, 4 }
 0x2fb   : > { %v440_v53 = vsel %vm380_vm11, %v439_v51, 1.0 }
 0x2fc   : > { %454 = vrot.lane.b32.xlu0 %v440_v53, %s791_s16 }
 0x2fe   : > { %460 = vrot.lane.b32.xlu1 %v706_v52, %s791_s16 }
 0x304   : > { %471 = vrot.lane.b32.xlu0 %v469_v55, %s791_s16 }
 0x368   : > { %v443_v56 = vpop.permute.xlu1 %442 }
 0x369   : > { %v445_v57 = vrot.slane %v443_v56, 4 }
 0x36b   : > { %v446_v58 = vsel %vm380_vm11, %v445_v57, 0.0 }
 0x36c   : > { %448 = vrot.lane.b32.xlu2 %v446_v58, %s791_s16  ;;  %s487_s16 = scalar_lea.sflag [#allocation5], %s290_s7 }
 0x36e   : > { %v455_v59 = vpop.permute.xlu0 %454 }
 0x36f   : > { %v457_v60 = vmul.f32 %v455_v59, %v434_v45 }
 0x370   : > { %v461_v61 = vpop.permute.xlu1 %460 }
 0x371   : > { %v463_v0 = vmul.f32 %v461_v61, %v457_v60 }
 0x374   : > { %465 = vrot.lane.b32.xlu2 %v382_v21, %s792_s17 }
 0x376   : > { %v472_v5 = vpop.permute.xlu0 %471 }
 0x3c6   : > { %v449_v62 = vpop.permute.xlu2 %448 }
 0x3c7   : > { %v451_v63 = vmul.f32 %v449_v62, %v434_v45 }
 0x3c9   : > { %v452_v1 = vadd.f32 %v451_v63, %v429_v49 }
 0x3cb   : > { %v464_v2 = vadd.f32 %v463_v0, %v452_v1 }
 0x3cd   : > { %481 = vrot.lane.b32.xlu2 %v464_v2, %s792_s17 }
 0x3ce   : > { %v466_v3 = vpop.permute.xlu2 %465 }
 0x3cf   : > { %v468_v4 = vmul.f32 %v466_v3, %v464_v2 }
 0x3d1   : > { %v474_v6 = vadd.f32 %v472_v5, %v468_v4 }
 0x3d3   : > { %476 = vrot.lane.b32.xlu1 %v474_v6, %s792_s17  ;;  %s725_s17 = sshra.s32 %s504_s15, 4  ;;  %s726_s17 = int_to_ptr.hbm [resolvable:$true] %s725_s17 }
 0x3d4   : > { %s727_s24 = scalar_lea.hbm %s726_s17, 8  ;;  %p732_p1 = scmp.lt.s32.totalorder %s726_s17, %s957_s5 }
 0x3d5   : > { %p728_p12 = scmp.ne.s32.totalorder %s726_s17, %s727_s24  ;;  %p733_p2 = scmp.lt.s32.totalorder %s731_s27, %s727_s24 }
 0x3d7   : > { %p729_p13 = pnand %p728_p12, %p863_p4  ;;  %p734_p3 = por %p733_p2, %p732_p1 }
 0x3d9   : > { %p730_p0 = pneg %p729_p13 }
 0x3db   : > { %p735_p5 = pnand %p734_p3, %p730_p0 }
 0x427   : > { %v482_v7 = vpop.permute.xlu2 %481 }
 0x428   : > { %485 = vst.msk [vmem:[#allocation3 - $0x7] sm:$0x80] %vm484_vm12, %v482_v7 }
 0x445   : > { %v477_v8 = vpop.permute.xlu1 %476 }
 0x446   : > { %479 = vst.msk [vmem:[%s292_s13] sm:$0xff] %vm342_vm2, %v477_v8 }
 0x447   : > { %738 = shalt.err (!%p735_p5)
}
 0x448   : > { %647 = dma.vmem_to_hbm [thread:$0]  (%p863_p4), %s502_s14, 128, %s504_s15, %s487_s16  }
 0x449 PF: > { %p653_p6 = scmp.ge.s32.totalorder %s789_s23, 2  ;;  %s515_s7 = sand.u32 1, %s769_s18  }
 0x44a   : > { %s516_s9 = scalar_lea.sflag [#allocation5], %s515_s7 }
 0x44b   : > { %p650_p7 = pnand %p653_p6, %p870_p8 }
 0x44d   : > { %p651_p9 = pneg %p650_p7 }
 0x44f   : > { %764 = dma.done.wait (%p651_p9), %s516_s9, 128  }
 0x450   : > { %766 = vsyncadd (%p651_p9), %s516_s9, 4294967168  ;;  %s18_s23 = sadd.s32 1, %s789_s23   ;;  %s960_s18 = smov %s773_s19 }
 0x451   : > { %p15_p10 = scmp.ge.s32.totalorder %s18_s23, 4   ;;  %s961_s19 = smov %s777_s20 }
 0x452   : > { %s962_s20 = smov %s876_s6  ;;  %s963_s21 = smov %s785_s22 }
 0x453   : > { %s964_s22 = smov %s966_s26  ;;  %17 = sbr.rel (!%p15_p10) target bundleno = 4 (0x4), region = 91 }
 0x458   :  { %522 = vsyncpa [#allocation5], 1 }
 0x459   :  { %524 = vsyncpa [#allocation5 + $0x1], 1 }

</bundles_post_ra>
